<compile_context>
chip_gen: v5e
topology: v5e:2x2
jax: 0.10.0
libtpu: 0.0.40
codegen_flags: <defaults>
</compile_context>

<pallas_src>
import jax
import jax.numpy as jnp
from jax.experimental import pallas as pl
from jax.experimental.pallas import tpu as pltpu

LAGS = 3
ENC_HIDDEN = 16
FC_HIDDEN = 16
INPUT_DIM = 2
IN_FLAT = INPUT_DIM * LAGS


def mlp_kernel(x_ref, w_fused_ref, b_fused_ref, w2t_ref, b2_ref, w3t_ref,
               b3_ref, o_ref):
    """One batch tile: x_ref [TILE_B, IN_FLAT] -> o_ref [TILE_B, 1]."""
    x = x_ref[...]                                                  # [TILE_B, IN_FLAT]

    # Encoders + concat + fc1 fused into a single MXU pass (weights folded in wrapper).
    h1 = jnp.dot(x, w_fused_ref[...], preferred_element_type=jnp.float32) + b_fused_ref[...]
    h1 = jnp.maximum(h1, 0.0)                                       # ReLU

    h2 = jnp.dot(h1, w2t_ref[...], preferred_element_type=jnp.float32) + b2_ref[...]
    h2 = jnp.maximum(h2, 0.0)                                       # ReLU

    # Final layer; b3 is a scalar read from SMEM.
    logits = jnp.dot(h2, w3t_ref[...], preferred_element_type=jnp.float32) + b3_ref[0, 0]
    o_ref[...] = jax.nn.sigmoid(logits)


def _pick_tile_b(batch):
    # Large batch tiles amortize the ~0.35us/grid-step overhead; 1024 rows keep
    # the double-buffered x/out tiles well under the 32 MiB scoped-VMEM default
    # on v5e/v6e/v7x, so no vmem_limit_bytes override is needed.
    return batch if batch <= 1024 else 1024


@jax.jit
def mlp_forward(x, w_enc, b_enc, w1, b1, w2, b2, w3, b3):
    batch = x.shape[0]
    dtype = jnp.float32

    # ---- host/XLA-side prep (tiny, once per call) ---------------------------
    # Flatten input to 2-D: only lane padding (6 -> 128) instead of padding the
    # minor (2, 3) dims of a 3-D block to (8, 128).
    x2 = x.reshape(batch, IN_FLAT).astype(dtype)

    # Block-diagonal encoder weight (valid: LeakyReLU(True) has slope 1.0 == identity).
    w_block = jnp.zeros((IN_FLAT, INPUT_DIM * ENC_HIDDEN), dtype=dtype)
    for i in range(INPUT_DIM):
        w_block = w_block.at[i * LAGS:(i + 1) * LAGS,
                             i * ENC_HIDDEN:(i + 1) * ENC_HIDDEN].set(w_enc[i].T)
    b_cat = b_enc.reshape(1, INPUT_DIM * ENC_HIDDEN)

    w_fused = (w_block @ w1.T).astype(dtype)                        # [IN_FLAT, FC_HIDDEN]
    b_fused = (b_cat @ w1.T + b1.reshape(1, FC_HIDDEN)).astype(dtype)
    w2t = w2.T.astype(dtype)                                        # [FC_HIDDEN, FC_HIDDEN]
    b2r = b2.reshape(1, FC_HIDDEN).astype(dtype)
    w3t = w3.T.astype(dtype)                                        # [FC_HIDDEN, 1]
    b3r = b3.reshape(1, 1).astype(dtype)

    tile_b = _pick_tile_b(batch)
    grid = (pl.cdiv(batch, tile_b),)
    vmem = pltpu.MemorySpace.VMEM
    smem = pltpu.MemorySpace.SMEM

    return pl.pallas_call(
        mlp_kernel,
        out_shape=jax.ShapeDtypeStruct((batch, 1), dtype),
        grid=grid,
        in_specs=[
            # x: tiled over batch, auto double-buffered by Pallas.
            pl.BlockSpec((tile_b, IN_FLAT), lambda i: (i, 0), memory_space=vmem),
            # Weights/biases: full-array blocks with constant index maps (resident).
            pl.BlockSpec((IN_FLAT, FC_HIDDEN), lambda i: (0, 0), memory_space=vmem),
            pl.BlockSpec((1, FC_HIDDEN), lambda i: (0, 0), memory_space=vmem),
            pl.BlockSpec((FC_HIDDEN, FC_HIDDEN), lambda i: (0, 0), memory_space=vmem),
            pl.BlockSpec((1, FC_HIDDEN), lambda i: (0, 0), memory_space=vmem),
            pl.BlockSpec((FC_HIDDEN, 1), lambda i: (0, 0), memory_space=vmem),
            # Scalar final bias in SMEM (avoids a padded (8,128) VMEM tile).
            pl.BlockSpec((1, 1), lambda i: (0, 0), memory_space=smem),
        ],
        # NOTE: (tile_b, 1) output is a masked store (last dim < 128 lanes);
        # acceptable at these sizes, amortized by the large batch tile.
        out_specs=pl.BlockSpec((tile_b, 1), lambda i: (i, 0), memory_space=vmem),
        compiler_params=pltpu.CompilerParams(
            dimension_semantics=("parallel",)),  # shards batch tiles across TCs on v7x
    )(x2, w_fused, b_fused, w2t, b2r, w3t, b3r)


def reference_forward(x, w_enc, b_enc, w1, b1, w2, b2, w3, b3):
    """Unfused JAX reference, faithful to the PyTorch module."""
    hiddens = []
    for i in range(INPUT_DIM):
        h = x[:, i, :] @ w_enc[i].T + b_enc[i]
        h = jnp.where(h >= 0.0, h, 1.0 * h)   # nn.LeakyReLU(True): slope == 1.0 (identity)
        hiddens.append(h)
    hidden = jnp.concatenate(hiddens, axis=1)
    h1 = jnp.maximum(hidden @ w1.T + b1, 0.0)
    h2 = jnp.maximum(h1 @ w2.T + b2, 0.0)
    return jax.nn.sigmoid(h2 @ w3.T + b3)


if __name__ == "__main__":
    key = jax.random.PRNGKey(0)
    k = jax.random.split(key, 10)

    B = 8
    x = jax.random.normal(k[0], (B, INPUT_DIM, LAGS), dtype=jnp.float32)

    # Deterministic synthetic parameters (PyTorch Linear layout [out, in]).
    w_enc = 0.3 * jax.random.normal(k[1], (INPUT_DIM, ENC_HIDDEN, LAGS), dtype=jnp.float32)
    b_enc = 0.1 * jax.random.normal(k[2], (INPUT_DIM, ENC_HIDDEN), dtype=jnp.float32)
    w1 = 0.3 * jax.random.normal(k[3], (FC_HIDDEN, INPUT_DIM * ENC_HIDDEN), dtype=jnp.float32)
    b1 = 0.1 * jax.random.normal(k[4], (1, FC_HIDDEN), dtype=jnp.float32)
    w2 = 0.3 * jax.random.normal(k[5], (FC_HIDDEN, FC_HIDDEN), dtype=jnp.float32)
    b2 = 0.1 * jax.random.normal(k[6], (1, FC_HIDDEN), dtype=jnp.float32)
    w3 = 0.3 * jax.random.normal(k[7], (1, FC_HIDDEN), dtype=jnp.float32)
    b3 = 0.1 * jax.random.normal(k[8], (1, 1), dtype=jnp.float32)

    out = mlp_forward(x, w_enc, b_enc, w1, b1, w2, b2, w3, b3)
    out = jax.block_until_ready(out)

    ref = reference_forward(x, w_enc, b_enc, w1, b1, w2, b2, w3, b3)
    assert out.shape == (B, 1)
    assert jnp.allclose(out, ref, atol=1e-5, rtol=1e-5), "mismatch vs JAX reference"

    print("KERNEL_OK")
</pallas_src>

<mosaic_0001>
module attributes {stable_mosaic.version = 11 : i64} {
  func.func @mlp_kernel(%arg0: i32, %arg1: memref<8x6xf32, #tpu.memory_space<vmem>>, %arg2: memref<6x16xf32, #tpu.memory_space<vmem>>, %arg3: memref<1x16xf32, #tpu.memory_space<vmem>>, %arg4: memref<16x16xf32, #tpu.memory_space<vmem>>, %arg5: memref<1x16xf32, #tpu.memory_space<vmem>>, %arg6: memref<16x1xf32, #tpu.memory_space<vmem>>, %arg7: memref<1x1xf32, #tpu.memory_space<smem>>, %arg8: memref<8x1xf32, #tpu.memory_space<vmem>>) attributes {dimension_semantics = [#tpu.dimension_semantics<parallel>], iteration_bounds = array<i64: 1>, scalar_prefetch = 0 : i64, scratch_operands = 0 : i64, tpu.core_type = #tpu.core_type<tc>, window_params = [{transform_indices = @transform_0, window_bounds = array<i64: 8, 6>}, {pipeline_mode = #tpu.pipeline_mode<synchronous>, transform_indices = @transform_1, window_bounds = array<i64: 6, 16>}, {pipeline_mode = #tpu.pipeline_mode<synchronous>, transform_indices = @transform_2, window_bounds = array<i64: 1, 16>}, {pipeline_mode = #tpu.pipeline_mode<synchronous>, transform_indices = @transform_3, window_bounds = array<i64: 16, 16>}, {pipeline_mode = #tpu.pipeline_mode<synchronous>, transform_indices = @transform_4, window_bounds = array<i64: 1, 16>}, {pipeline_mode = #tpu.pipeline_mode<synchronous>, transform_indices = @transform_5, window_bounds = array<i64: 16, 1>}, {transform_indices = @transform_6, window_bounds = array<i64: 1, 1>}, {transform_indices = @transform_7, window_bounds = array<i64: 8, 1>}]} {
    %c0 = arith.constant 0 : index
    %c0_0 = arith.constant 0 : index
    %0 = vector.load %arg1[%c0, %c0_0] : memref<8x6xf32, #tpu.memory_space<vmem>>, vector<8x6xf32>
    %c0_1 = arith.constant 0 : index
    %c0_2 = arith.constant 0 : index
    %1 = vector.load %arg2[%c0_1, %c0_2] : memref<6x16xf32, #tpu.memory_space<vmem>>, vector<6x16xf32>
    %cst = arith.constant dense<0.000000e+00> : vector<8x16xf32>
    %2 = tpu.matmul %0, %1, %cst {dimension_numbers = #tpu.dot_dimension_numbers<[1], [0], [0], [1], [0, 0, 1, 1], [], []>} : vector<8x6xf32>, vector<6x16xf32>, vector<8x16xf32> -> vector<8x16xf32>
    %c0_3 = arith.constant 0 : index
    %c0_4 = arith.constant 0 : index
    %3 = vector.load %arg3[%c0_3, %c0_4] : memref<1x16xf32, #tpu.memory_space<vmem>>, vector<1x16xf32>
    %4 = vector.broadcast %3 : vector<1x16xf32> to vector<8x16xf32>
    %5 = arith.addf %2, %4 : vector<8x16xf32>
    %cst_5 = arith.constant 0.000000e+00 : f32
    %6 = vector.broadcast %cst_5 : f32 to vector<8x16xf32>
    %7 = arith.maximumf %5, %6 : vector<8x16xf32>
    %c0_6 = arith.constant 0 : index
    %c0_7 = arith.constant 0 : index
    %8 = vector.load %arg4[%c0_6, %c0_7] : memref<16x16xf32, #tpu.memory_space<vmem>>, vector<16x16xf32>
    %cst_8 = arith.constant dense<0.000000e+00> : vector<8x16xf32>
    %9 = tpu.matmul %7, %8, %cst_8 {dimension_numbers = #tpu.dot_dimension_numbers<[1], [0], [0], [1], [0, 0, 1, 1], [], []>} : vector<8x16xf32>, vector<16x16xf32>, vector<8x16xf32> -> vector<8x16xf32>
    %c0_9 = arith.constant 0 : index
    %c0_10 = arith.constant 0 : index
    %10 = vector.load %arg5[%c0_9, %c0_10] : memref<1x16xf32, #tpu.memory_space<vmem>>, vector<1x16xf32>
    %11 = vector.broadcast %10 : vector<1x16xf32> to vector<8x16xf32>
    %12 = arith.addf %9, %11 : vector<8x16xf32>
    %cst_11 = arith.constant 0.000000e+00 : f32
    %13 = vector.broadcast %cst_11 : f32 to vector<8x16xf32>
    %14 = arith.maximumf %12, %13 : vector<8x16xf32>
    %c0_12 = arith.constant 0 : index
    %c0_13 = arith.constant 0 : index
    %15 = vector.load %arg6[%c0_12, %c0_13] : memref<16x1xf32, #tpu.memory_space<vmem>>, vector<16x1xf32>
    %cst_14 = arith.constant dense<0.000000e+00> : vector<8x1xf32>
    %16 = tpu.matmul %14, %15, %cst_14 {dimension_numbers = #tpu.dot_dimension_numbers<[1], [0], [0], [1], [0, 0, 1, 1], [], []>} : vector<8x16xf32>, vector<16x1xf32>, vector<8x1xf32> -> vector<8x1xf32>
    %c0_15 = arith.constant 0 : index
    %c0_16 = arith.constant 0 : index
    %17 = memref.load %arg7[%c0_15, %c0_16] : memref<1x1xf32, #tpu.memory_space<smem>>
    %18 = vector.broadcast %17 : f32 to vector<8x1xf32>
    %19 = arith.addf %16, %18 : vector<8x1xf32>
    %20 = arith.negf %19 : vector<8x1xf32>
    %21 = math.exp %20 : vector<8x1xf32>
    %cst_17 = arith.constant 1.000000e+00 : f32
    %22 = vector.broadcast %cst_17 : f32 to vector<8x1xf32>
    %23 = arith.addf %22, %21 : vector<8x1xf32>
    %24 = arith.divf %22, %23 : vector<8x1xf32>
    %c0_18 = arith.constant 0 : index
    %c0_19 = arith.constant 0 : index
    %25 = vector.load %arg8[%c0_18, %c0_19] : memref<8x1xf32, #tpu.memory_space<vmem>>, vector<8x1xf32>
    tpu.vector_store %arg8[%c0_18, %c0_19], %24 {strides = array<i32>} : memref<8x1xf32, #tpu.memory_space<vmem>>, vector<8x1xf32>,
    return
  }
  func.func @transform_0(%arg0: i32) -> (i32, i32) {
    %c0_i32 = arith.constant 0 : i32
    %c0_i32_0 = arith.constant 0 : i32
    return %arg0, %c0_i32 : i32, i32
  }
  func.func @transform_1(%arg0: i32) -> (i32, i32) {
    %c0_i32 = arith.constant 0 : i32
    %c0_i32_0 = arith.constant 0 : i32
    %c0_i32_1 = arith.constant 0 : i32
    return %c0_i32, %c0_i32_0 : i32, i32
  }
  func.func @transform_2(%arg0: i32) -> (i32, i32) {
    %c0_i32 = arith.constant 0 : i32
    %c0_i32_0 = arith.constant 0 : i32
    %c0_i32_1 = arith.constant 0 : i32
    return %c0_i32, %c0_i32_0 : i32, i32
  }
  func.func @transform_3(%arg0: i32) -> (i32, i32) {
    %c0_i32 = arith.constant 0 : i32
    %c0_i32_0 = arith.constant 0 : i32
    %c0_i32_1 = arith.constant 0 : i32
    return %c0_i32, %c0_i32_0 : i32, i32
  }
  func.func @transform_4(%arg0: i32) -> (i32, i32) {
    %c0_i32 = arith.constant 0 : i32
    %c0_i32_0 = arith.constant 0 : i32
    %c0_i32_1 = arith.constant 0 : i32
    return %c0_i32, %c0_i32_0 : i32, i32
  }
  func.func @transform_5(%arg0: i32) -> (i32, i32) {
    %c0_i32 = arith.constant 0 : i32
    %c0_i32_0 = arith.constant 0 : i32
    %c0_i32_1 = arith.constant 0 : i32
    return %c0_i32, %c0_i32_0 : i32, i32
  }
  func.func @transform_6(%arg0: i32) -> (i32, i32) {
    %c0_i32 = arith.constant 0 : i32
    %c0_i32_0 = arith.constant 0 : i32
    %c0_i32_1 = arith.constant 0 : i32
    return %c0_i32, %c0_i32_0 : i32, i32
  }
  func.func @transform_7(%arg0: i32) -> (i32, i32) {
    %c0_i32 = arith.constant 0 : i32
    %c0_i32_0 = arith.constant 0 : i32
    return %arg0, %c0_i32 : i32, i32
  }
}

</mosaic_0001>

<bundles_post_ra>
// kernel: mlp_forward.1
= control target key start
LH: loop header
LB: loop body
LE: loop exit
PB: predicated region body
PF: predicated region fallthrough
CT: control target
= control target key end

     0   :  { %vm37_vm0 = vcmask 1045504   ;;  %vm33_vm1 = vcmask 48128   ;;  %vm68_vm2 = vcmask 130048   ;;  %vm139_vm6 = vcmask 7168   ;;  %s226_s1 = inlined_call_operand.vmem [shape: f32[6,16], index: 1, kind: input, shape index: {}]   ;;  %s227_s0 = inlined_call_operand.vmem [shape: f32[8,6], index: 0, kind: input, shape index: {}]   ;;  %s228_s2 = inlined_call_operand.vmem [shape: f32[1,16], index: 2, kind: input, shape index: {}]   ;;  %s229_s4 = inlined_call_operand.vmem [shape: f32[1,16], index: 4, kind: input, shape index: {}]   ;;  %s230_s3 = inlined_call_operand.vmem [shape: f32[16,16], index: 3, kind: input, shape index: {}]   ;;  %s231_s5 = inlined_call_operand.vmem [shape: f32[16,1], index: 5, kind: input, shape index: {}]   ;;  %s232_s6 = inlined_call_operand.<no memory space> [shape: f32[1,1], index: 6, kind: input, shape index: {}]   ;;  %s233_s7 = inlined_call_operand.vmem [shape: f32[8,1], index: 7, kind: output, shape index: {}]  }
   0x1   :  { %v28_v0 = vld [vmem:[%s226_s1] sm:$0x3f]  ;;  %v63_v2 = vld [vmem:[%s230_s3 + $0x8] sm:$0xff]  ;;  %v96_v14 = vstv %s232_s6 }
   0x2   :  { %v27_v1 = vld [vmem:[%s227_s0] sm:$0xff]  ;;  %145 = vmatpush.msk.msra.mxu0 %vm37_vm0, %v28_v0  ;;  %86 = vmatpush.msra.mxu1 %v63_v2  ;;  %v94_v8 = vld [vmem:[%s231_s5 + $0x8] sm:$0xff] }
   0x3   :  { %146 = vmatmul.msk.f32.vlgmr.msra.gmra.mxu0 %vm33_vm1, %v27_v1  ;;  %v62_v3 = vld [vmem:[%s230_s3] sm:$0xff]  ;;  %114 = vmatpush.msra.mxu2 %v94_v8 }
   0x4   :  { %87 = vmatpush.msra.mxu1 %v62_v3  ;;  %v150_v4 = vld [vmem:[%s228_s2] ss:$0 sm:$0xff] }
   0x5   :  { %v93_v9 = vld [vmem:[%s231_s5] sm:$0xff] }
   0x6   :  { %115 = vmatpush.msra.mxu2 %v93_v9  ;;  %v151_v10 = vld [vmem:[%s229_s4] ss:$0 sm:$0xff] }
  0x80   :  { %v58_v5 = vpop.f32.mrf.mxu0 }
  0x81   :  { %v59_v6 = vadd.f32 %v150_v4, %v58_v5 }
  0x83   :  { %v61_v7 = vmax.f32 %v59_v6, 0.0 }
  0x85   :  { %147 = vmatmul.msk.f32.vlgmr.msra.gmra.mxu1 %vm68_vm2, %v61_v7 }
 0x102   :  { %v89_v11 = vpop.f32.mrf.mxu1 }
 0x103   :  { %v90_v12 = vadd.f32 %v151_v10, %v89_v11 }
 0x105   :  { %v92_v13 = vmax.f32 %v90_v12, 0.0 }
 0x107   :  { %148 = vmatmul.msk.f32.vlgmr.msra.gmra.mxu2 %vm68_vm2, %v92_v13 }
 0x18a   :  { %v117_v15 = vpop.f32.mrf.mxu2 }
 0x18b   :  { %v118_v16 = vadd.f32 %v117_v15, %v96_v14 }
 0x18d   :  { %v149_v17 = vmul.f32 -1.442695, %v118_v16 }
 0x18f   :  { %152 = vpow2.f32 %v149_v17 }
 0x195   :  { %v153_v18 = vpop.eup %152 }
 0x196   :  { %v123_v19 = vadd.f32 1.0, %v153_v18 }
 0x198   :  { %154 = vrcp.f32 %v123_v19  ;;  %v135_v23 = vand.u32 2147483648, %v123_v19  ;;  %v133_v25 = vand.u32 2147483647, %v123_v19  ;;  %vm129_vm4 = vweird.f32 %v123_v19 }
 0x19a   :  { %v136_v27 = vor.u32 1.1754944e-38, %v135_v23  ;;  %vm134_vm7 = vcmp.eq.f32.partialorder %v133_v25, 8.507059e+37 }
 0x19e   :  { %v155_v20 = vpop.eup %154 }
 0x19f   :  { %v125_v21 = vmul.f32 %v155_v20, %v123_v19  ;;  %vm130_vm3 = vweird.f32 %v155_v20 }
 0x1a0   :  { %vm131_vm5 = vmor %vm129_vm4, %vm130_vm3 }
 0x1a1   :  { %v126_v22 = vsub.f32 1.0, %v125_v21 }
 0x1a3   :  { %v127_v24 = vmul.f32 %v155_v20, %v126_v22 }
 0x1a5   :  { %v128_v26 = vadd.f32 %v155_v20, %v127_v24 }
 0x1a7   :  { %v132_v28 = vsel %vm131_vm5, %v155_v20, %v128_v26 }
 0x1a8   :  { %v137_v29 = vsel %vm134_vm7, %v136_v27, %v132_v28 }
 0x1a9   :  { %140 = vst.msk [vmem:[%s233_s7] sm:$0xff] %vm139_vm6, %v137_v29 }

</bundles_post_ra>
